<compile_context>
chip_gen: v5e
topology: v5e:2x2
jax: 0.10.0
libtpu: 0.0.40
codegen_flags: <defaults>
</compile_context>

<pallas_src>
import jax
import jax.numpy as jnp
from jax.experimental import pallas as pl
from jax.experimental.pallas import tpu as pltpu


def _identity_kernel(x_ref, o_ref):
    # Straight VMEM copy of the current lane-dense block.
    o_ref[...] = x_ref[...]


def _base_model_forward_impl(x: jnp.ndarray) -> jnp.ndarray:
    """Pass-through forward of BaseModel through a Pallas TPU identity kernel.

    Accepts any shape/float dtype; returns a tensor identical to x.
    """
    orig_shape = x.shape
    dtype = x.dtype
    itemsize = jnp.dtype(dtype).itemsize
    total = int(x.size)

    # Dtype-aware sublane packing: 8 rows for 32-bit, 16 for 16-bit, 32 for 8-bit.
    rows = 8 * max(1, 4 // itemsize)

    # Target ~2 MiB per block: large enough to amortize per-grid-step overhead
    # (~0.35 us) and sit near the HBM roofline, small enough that double-
    # buffered in+out (4 live copies) fits even v5e's 16 MiB scoped VMEM.
    target_block_bytes = 2 * 1024 * 1024
    max_block_cols = max(128, (target_block_bytes // (rows * itemsize)) // 128 * 128)

    # Lane-dense layout: (rows, cols) with cols a multiple of 128.
    cols_single = ((total + rows - 1) // rows + 127) // 128 * 128
    if cols_single <= max_block_cols:
        # Whole array in one block (the common small-input case, e.g. the demo).
        block_cols = cols_single
        cols = cols_single
    else:
        # Chunk the lane dimension into equal, wide, 128-multiple blocks.
        block_cols = max_block_cols
        n_blocks = (total + rows * block_cols - 1) // (rows * block_cols)
        cols = n_blocks * block_cols

    padded_total = rows * cols
    x_flat = x.reshape(-1)
    if padded_total != total:
        x_flat = jnp.pad(x_flat, (0, padded_total - total))
    x2d = x_flat.reshape(rows, cols)

    grid = (cols // block_cols,)

    out2d = pl.pallas_call(
        _identity_kernel,
        out_shape=jax.ShapeDtypeStruct((rows, cols), dtype),
        grid=grid,
        in_specs=[pl.BlockSpec((rows, block_cols), lambda j: (0, j))],
        out_specs=pl.BlockSpec((rows, block_cols), lambda j: (0, j)),
        # Identity op: let XLA reuse the input HBM buffer for the output.
        input_output_aliases={0: 0},
        compiler_params=pltpu.CompilerParams(
            dimension_semantics=("parallel",),
        ),
    )(x2d)

    return out2d.reshape(-1)[:total].reshape(orig_shape)


# jit the wrapper so the reshape/pad intermediates are freely donatable to the
# aliased pallas_call and fuse away.
base_model_forward = jax.jit(_base_model_forward_impl)


if __name__ == "__main__":
    key = jax.random.PRNGKey(0)
    # Small NCHW input consistent with the module's conventions.
    x = jax.random.normal(key, (2, 4, 16, 16), dtype=jnp.float32)

    y = base_model_forward(x)
    y = jax.block_until_ready(y)

    # BaseModel contributes no parameters / no transform: output must equal input.
    assert y.shape == x.shape and y.dtype == x.dtype
    assert bool(jnp.all(y == x))

    print("KERNEL_OK")
</pallas_src>

<mosaic_0001>
module attributes {stable_mosaic.version = 11 : i64} {
  func.func @_identity_kernel(%arg0: i32, %arg1: memref<8x256xf32, #tpu.memory_space<vmem>>, %arg2: memref<8x256xf32, #tpu.memory_space<vmem>>) attributes {dimension_semantics = [#tpu.dimension_semantics<parallel>], iteration_bounds = array<i64: 1>, scalar_prefetch = 0 : i64, scratch_operands = 0 : i64, tpu.core_type = #tpu.core_type<tc>, window_params = [{transform_indices = @transform_0, window_bounds = array<i64: 8, 256>}, {transform_indices = @transform_1, window_bounds = array<i64: 8, 256>}]} {
    %c0 = arith.constant 0 : index
    %c0_0 = arith.constant 0 : index
    %0 = vector.load %arg1[%c0, %c0_0] : memref<8x256xf32, #tpu.memory_space<vmem>>, vector<8x256xf32>
    %c0_1 = arith.constant 0 : index
    %c0_2 = arith.constant 0 : index
    %1 = vector.load %arg2[%c0_1, %c0_2] : memref<8x256xf32, #tpu.memory_space<vmem>>, vector<8x256xf32>
    tpu.vector_store %arg2[%c0_1, %c0_2], %0 {strides = array<i32>} : memref<8x256xf32, #tpu.memory_space<vmem>>, vector<8x256xf32>,
    return
  }
  func.func @transform_0(%arg0: i32) -> (i32, i32) {
    %c0_i32 = arith.constant 0 : i32
    %c0_i32_0 = arith.constant 0 : i32
    return %c0_i32, %arg0 : i32, i32
  }
  func.func @transform_1(%arg0: i32) -> (i32, i32) {
    %c0_i32 = arith.constant 0 : i32
    %c0_i32_0 = arith.constant 0 : i32
    return %c0_i32, %arg0 : i32, i32
  }
}

</mosaic_0001>

<bundles_post_ra>
// kernel: _base_model_forward_impl.1
= control target key start
LH: loop header
LB: loop body
LE: loop exit
PB: predicated region body
PF: predicated region fallthrough
CT: control target
= control target key end

     0   :  { %s38_s0 = inlined_call_operand.vmem [shape: f32[8,256], index: 0, kind: input, shape index: {}, may-alias: {0,1}]   ;;  %s39_s1 = inlined_call_operand.vmem [shape: f32[8,256], index: 1, kind: output, shape index: {}, may-alias: {0,1}]  }
   0x1   :  { %v8_v0 = vld [vmem:[%s38_s0] sm:$0xff]  ;;  %v9_v1 = vld [vmem:[%s38_s0 + $0x8] sm:$0xff] }
   0x2   :  { %10 = vst [vmem:[%s39_s1] sm:$0xff] %v8_v0 }
   0x3   :  { %11 = vst [vmem:[%s39_s1 + $0x8] sm:$0xff] %v9_v1 }

</bundles_post_ra>
